<compile_context>
chip_gen: v6e
topology: v6e:2x2x1
jax: 0.10.0
libtpu: 0.0.40
codegen_flags: <defaults>
</compile_context>

<pallas_src>
import functools
import math

import jax
import jax.numpy as jnp
from jax.experimental import pallas as pl
from jax.experimental.pallas import tpu as pltpu

MIN_NORM = 1e-5  # clamp used by hyptorch's expmap0


def _hyperbolic_mlr_kernel(c_ref, x_ref, x2_ref, pa_ref, vec_ref, out_ref):
    """One (Bt, Ct) logits tile.

    x_ref   : (Bt, D)     input points (native dtype, MXU operand)
    x2_ref  : (Bt, 1)     ||x||^2 in f32 (precomputed in the wrapper)
    pa_ref  : (D, 2*Ct)   fused MXU RHS: [p_poincare^T | a_poincare^T] for this class tile
    vec_ref : (8, Ct)     per-class f32 constants:
                          rows = [beta, ||P||^2, <P,A>, c^2*||P||^2, 2*sqrt(c)/||A||, k, 0, 0]
    out_ref : (Bt, Ct)    logits (lane-dense along classes)
    """
    c = c_ref[0, 0]
    ct = out_ref.shape[-1]

    # Single fused MXU matmul; slice at the 128-aligned c_tile boundary.
    pxa = jnp.dot(x_ref[...], pa_ref[...], preferred_element_type=jnp.float32)  # (Bt, 2Ct)
    px = pxa[:, :ct]                 # X . P^T
    xa = pxa[:, ct:]                 # X . A^T

    x2 = x2_ref[...]                 # (Bt, 1)
    beta = vec_ref[0:1, :]           # 1 - c*||P||^2
    p2 = vec_ref[1:2, :]             # ||P||^2
    pa = vec_ref[2:3, :]             # <P, A>
    ccp2 = vec_ref[3:4, :]           # c^2 * ||P||^2
    s = vec_ref[4:5, :]              # 2*sqrt(c) / ||A||
    k = vec_ref[5:6, :]              # lambda_P * ||A|| / sqrt(c)

    # alpha = 1 - 2c<P,x> + c||x||^2 ; denom = 1 - 2c<P,x> + c^2||P||^2||x||^2 + 1e-5
    cx2m = c * x2 - 1e-5                              # (Bt, 1) per-row
    t = (1.0 + 1e-5) + (-2.0 * c) * px                # shared term, eps folded in
    alpha = t + cx2m
    denom = t + ccp2 * x2

    inv = pl.reciprocal(denom, approx=True)           # EUP estimate
    inv = inv * (2.0 - denom * inv)                   # + 1 Newton step (~f32)

    u = alpha * inv
    v = beta * inv
    # <mob, A> and ||mob||^2 for mob = mobius_add(-P, x), expanded analytically.
    mob_dot_a = v * xa - u * pa
    uv = u * v
    mob_sq = u * u * p2 - (uv + uv) * px + v * v * x2
    mob_sq = jnp.maximum(mob_sq, 0.0)                 # guard f32 cancellation (true value >= 0)

    w = 1.0 - c * mob_sq
    invw = pl.reciprocal(w, approx=True)
    invw = invw * (2.0 - w * invw)
    invw = invw * (2.0 - w * invw)                    # 2 Newton steps

    z = (s * mob_dot_a) * invw
    asinh_z = jnp.where(z >= 0.0, 1.0, -1.0) * jnp.log(
        jnp.abs(z) + jnp.sqrt(z * z + 1.0))           # stable arcsinh
    out_ref[...] = (k * asinh_z).astype(out_ref.dtype)


def _round_up(n, m):
    return ((n + m - 1) // m) * m


@functools.lru_cache(maxsize=1)
def _vmem_capacity_bytes():
    try:
        return int(pltpu.get_tpu_info().vmem_capacity_bytes)
    except Exception:
        return 64 * 1024 * 1024  # conservative fallback (v7x per-core VMEM)


def _pick_tiles(b_req, c_req, d, itemsize, block_b, block_c, sub, budget):
    """Pick (b_tile, c_tile) that fit the double-buffered VMEM budget."""
    bt = min(block_b, b_req)
    ct = min(block_c, c_req)

    def footprint(bt_, ct_):
        # double-buffered: x, [P^T|A^T], out (native dtype) + x2, vec (f32)
        return 2 * (bt_ * d * itemsize + 2 * d * ct_ * itemsize + bt_ * ct_ * itemsize
                    + bt_ * 4 + 8 * ct_ * 4)

    while footprint(bt, ct) > budget:
        if ct >= bt and ct > 128:
            ct = max(128, 128 * ((ct // 2) // 128))
        elif bt > sub:
            bt = max(sub, sub * ((bt // 2) // sub))
        else:
            break
    return bt, ct


@functools.partial(jax.jit, static_argnames=("block_b", "block_c"))
def hyperbolic_mlr(x, a_vals, p_vals, curvature, *, block_b=512, block_c=512):
    B, D = x.shape
    C = a_vals.shape[0]
    dtype = x.dtype
    itemsize = x.dtype.itemsize
    sub = 16 if dtype == jnp.bfloat16 else 8           # native sublane packing

    block_b = _round_up(max(block_b, sub), sub)
    block_c = _round_up(max(block_c, 128), 128)
    b_req = _round_up(B, sub)
    c_req = _round_up(C, 128)                           # lane-dense output store

    cap = _vmem_capacity_bytes()
    b_tile, c_tile = _pick_tiles(b_req, c_req, D, itemsize, block_b, block_c, sub,
                                 budget=int(cap * 0.55))
    grid_b = pl.cdiv(b_req, b_tile)
    grid_c = pl.cdiv(c_req, c_tile)
    b_pad = grid_b * b_tile
    c_pad = grid_c * c_tile

    # ---- Per-class preprocessing hoisted to XLA (O(C*D), overlapped with the kernel). ----
    c = jnp.asarray(curvature, dtype=jnp.float32)
    sqrt_c = jnp.sqrt(c)
    p32 = p_vals.astype(jnp.float32)
    a32 = a_vals.astype(jnp.float32)
    p_norm = jnp.maximum(jnp.sqrt(jnp.sum(p32 * p32, axis=1, keepdims=True)), MIN_NORM)
    scn = sqrt_c * p_norm
    P = (jnp.tanh(scn) / scn) * p32                     # expmap0(p)      (C, D)
    p2 = jnp.sum(P * P, axis=1)                         # ||P||^2         (C,)
    beta = 1.0 - c * p2                                 # conformal factor
    A = a32 * beta[:, None]                             # a_poincare      (C, D)
    a_norm = jnp.sqrt(jnp.sum(A * A, axis=1))           # ||A||           (C,)
    k = 2.0 * a_norm / (beta * sqrt_c)                  # lambda_P*||A||/sqrt(c)
    s = 2.0 * sqrt_c / a_norm
    pa_dot = jnp.sum(P * A, axis=1)
    ccp2 = (c * c) * p2

    # Pad derived per-class arrays so padded columns stay finite (they are sliced off).
    pad_c = c_pad - C
    if pad_c:
        P = jnp.pad(P, ((0, pad_c), (0, 0)))
        A = jnp.pad(A, ((0, pad_c), (0, 0)))
        beta = jnp.pad(beta, (0, pad_c), constant_values=1.0)
        p2 = jnp.pad(p2, (0, pad_c))
        pa_dot = jnp.pad(pa_dot, (0, pad_c))
        ccp2 = jnp.pad(ccp2, (0, pad_c))
        s = jnp.pad(s, (0, pad_c), constant_values=1.0)
        k = jnp.pad(k, (0, pad_c))

    zeros_c = jnp.zeros_like(beta)
    vec = jnp.stack([beta, p2, pa_dot, ccp2, s, k, zeros_c, zeros_c], axis=0)   # (8, c_pad) f32

    # Fused MXU RHS, interleaved per class tile: block ci = [P^T tile ci | A^T tile ci].
    P_t = P.T.astype(dtype)                              # (D, c_pad)
    A_t = A.T.astype(dtype)
    pa_cat = jnp.concatenate(
        [P_t.reshape(D, grid_c, c_tile), A_t.reshape(D, grid_c, c_tile)],
        axis=2).reshape(D, 2 * c_pad)

    x_p = x if b_pad == B else jnp.pad(x, ((0, b_pad - B), (0, 0)))
    xf = x_p.astype(jnp.float32)
    x2 = jnp.sum(xf * xf, axis=1, keepdims=True)         # (b_pad, 1) f32

    c_arr = c.reshape(1, 1)

    # Grid order: the operand indexed by the inner axis is re-streamed once per outer step;
    # put the cheaper-to-restream operand on the inside (matters on v5e's ~820 GB/s HBM).
    classes_outer = grid_c * b_pad * D <= grid_b * 2 * D * c_pad
    if classes_outer:
        grid = (grid_c, grid_b)

        def bmap(f):
            return lambda ci, bi: f(bi, ci)
    else:
        grid = (grid_b, grid_c)

        def bmap(f):
            return lambda bi, ci: f(bi, ci)

    grid_spec = pltpu.PrefetchScalarGridSpec(
        num_scalar_prefetch=0,
        grid=grid,
        in_specs=[
            pl.BlockSpec(memory_space=pltpu.MemorySpace.SMEM),              # curvature scalar
            pl.BlockSpec((b_tile, D), bmap(lambda bi, ci: (bi, 0))),        # x tile
            pl.BlockSpec((b_tile, 1), bmap(lambda bi, ci: (bi, 0))),        # ||x||^2 tile
            pl.BlockSpec((D, 2 * c_tile), bmap(lambda bi, ci: (0, ci))),    # [P^T | A^T] tile
            pl.BlockSpec((8, c_tile), bmap(lambda bi, ci: (0, ci))),        # per-class consts
        ],
        out_specs=pl.BlockSpec((b_tile, c_tile), bmap(lambda bi, ci: (bi, ci))),
    )

    out = pl.pallas_call(
        _hyperbolic_mlr_kernel,
        out_shape=jax.ShapeDtypeStruct((b_pad, c_pad), dtype),
        grid_spec=grid_spec,
        compiler_params=pltpu.CompilerParams(
            dimension_semantics=("parallel", "parallel"),   # no cross-step state -> both parallel
            vmem_limit_bytes=int(cap * 0.75),               # ~96 MiB on 128 MiB parts, 48 on v7x
        ),
    )(c_arr, x_p, x2, pa_cat, vec)

    return out[:B, :C]


def _reference(x, a_vals, p_vals, c):
    """Pure-JAX replica of the PyTorch forward (materializes the (C,B,D) tensor)."""
    sqrt_c = jnp.sqrt(c)
    p_norm = jnp.maximum(jnp.linalg.norm(p_vals, axis=-1, keepdims=True), MIN_NORM)
    P = jnp.tanh(sqrt_c * p_norm) * p_vals / (sqrt_c * p_norm)
    conformal = 1.0 - c * jnp.sum(P * P, axis=1, keepdims=True)
    A = a_vals * conformal

    lam = 2.0 / (1.0 - c * jnp.sum(P * P, axis=1))
    kk = lam * jnp.linalg.norm(A, axis=1) / sqrt_c
    mx = -P
    xy = jnp.einsum("ij,kj->ik", mx, x)
    x2 = jnp.sum(mx * mx, axis=-1, keepdims=True)
    y2 = jnp.sum(x * x, axis=-1, keepdims=True)
    num = 1.0 + 2.0 * c * xy + c * y2.T
    num = num[:, :, None] * mx[:, None, :] + (1.0 - c * x2)[:, :, None] * x[None, :, :]
    den = 1.0 + 2.0 * c * xy + c * c * x2 * y2.T
    mob = num / (den[:, :, None] + 1e-5)
    nume = 2.0 * sqrt_c * jnp.sum(mob * A[:, None, :], axis=-1)
    deno = jnp.linalg.norm(A, axis=1, keepdims=True) * (1.0 - c * jnp.sum(mob * mob, axis=2))
    logit = kk[:, None] * jnp.arcsinh(nume / deno)
    return logit.T


def _make_inputs(key, batch, ball_dim, n_classes):
    k_a, k_p, k_x = jax.random.split(key, 3)
    # kaiming_uniform_(a=sqrt(5)) on (n_classes, ball_dim) -> U(-1/sqrt(D), 1/sqrt(D))
    bound = 1.0 / math.sqrt(ball_dim)
    a_vals = jax.random.uniform(k_a, (n_classes, ball_dim), jnp.float32, -bound, bound)
    p_vals = jax.random.uniform(k_p, (n_classes, ball_dim), jnp.float32, -bound, bound)
    x = 0.1 * jax.random.normal(k_x, (batch, ball_dim), jnp.float32)  # well inside the ball
    return x, a_vals, p_vals


if __name__ == "__main__":
    key = jax.random.PRNGKey(0)
    k1, k2 = jax.random.split(key)

    # Case 1: module demo shapes (single-tile path, grid (1,1), padded to lane-dense C=128).
    batch, ball_dim, n_classes = 8, 32, 16
    curvature = 1.0
    x, a_vals, p_vals = _make_inputs(k1, batch, ball_dim, n_classes)
    logits = hyperbolic_mlr(x, a_vals, p_vals, curvature)
    jax.block_until_ready(logits)
    ref = _reference(x, a_vals, p_vals, jnp.float32(curvature))
    assert logits.shape == (batch, n_classes)
    assert jnp.allclose(logits, ref, rtol=1e-3, atol=2e-4), "mismatch vs reference (small)"

    # Case 2: non-aligned shapes exercising the tiled path (padding on B and C, 2x3 grid).
    batch2, ball_dim2, n_classes2 = 520, 40, 300
    curvature2 = 0.7
    x2, a_vals2, p_vals2 = _make_inputs(k2, batch2, ball_dim2, n_classes2)
    logits2 = hyperbolic_mlr(x2, a_vals2, p_vals2, curvature2, block_b=256, block_c=256)
    jax.block_until_ready(logits2)
    ref2 = _reference(x2, a_vals2, p_vals2, jnp.float32(curvature2))
    assert logits2.shape == (batch2, n_classes2)
    assert jnp.allclose(logits2, ref2, rtol=1e-3, atol=2e-4), "mismatch vs reference (tiled)"

    print("KERNEL_OK")
</pallas_src>

<mosaic_0001>
module attributes {stable_mosaic.version = 11 : i64} {
  func.func @_hyperbolic_mlr_kernel(%arg0: i32, %arg1: i32, %arg2: memref<1x1xf32, #tpu.memory_space<smem>>, %arg3: memref<8x32xf32, #tpu.memory_space<vmem>>, %arg4: memref<8x1xf32, #tpu.memory_space<vmem>>, %arg5: memref<32x256xf32, #tpu.memory_space<vmem>>, %arg6: memref<8x128xf32, #tpu.memory_space<vmem>>, %arg7: memref<8x128xf32, #tpu.memory_space<vmem>>) attributes {dimension_semantics = [#tpu.dimension_semantics<parallel>, #tpu.dimension_semantics<parallel>], iteration_bounds = array<i64: 1, 1>, scalar_prefetch = 0 : i64, scratch_operands = 0 : i64, tpu.core_type = #tpu.core_type<tc>, window_params = [{transform_indices = @transform_0, window_bounds = array<i64: 1, 1>}, {transform_indices = @transform_1, window_bounds = array<i64: 8, 32>}, {transform_indices = @transform_2, window_bounds = array<i64: 8, 1>}, {transform_indices = @transform_3, window_bounds = array<i64: 32, 256>}, {transform_indices = @transform_4, window_bounds = array<i64: 8, 128>}, {transform_indices = @transform_5, window_bounds = array<i64: 8, 128>}]} {
    %c0 = arith.constant 0 : index
    %c0_0 = arith.constant 0 : index
    %0 = memref.load %arg2[%c0, %c0_0] : memref<1x1xf32, #tpu.memory_space<smem>>
    %c0_1 = arith.constant 0 : index
    %c0_2 = arith.constant 0 : index
    %1 = vector.load %arg3[%c0_1, %c0_2] : memref<8x32xf32, #tpu.memory_space<vmem>>, vector<8x32xf32>
    %c0_3 = arith.constant 0 : index
    %c0_4 = arith.constant 0 : index
    %2 = vector.load %arg5[%c0_3, %c0_4] : memref<32x256xf32, #tpu.memory_space<vmem>>, vector<32x256xf32>
    %cst = arith.constant dense<0.000000e+00> : vector<8x256xf32>
    %3 = tpu.matmul %1, %2, %cst {dimension_numbers = #tpu.dot_dimension_numbers<[1], [0], [0], [1], [0, 0, 1, 1], [], []>} : vector<8x32xf32>, vector<32x256xf32>, vector<8x256xf32> -> vector<8x256xf32>
    %4 = vector.extract_strided_slice %3 {offsets = [0, 0], sizes = [8, 128], strides = [1, 1]} : vector<8x256xf32> to vector<8x128xf32>
    %5 = vector.extract_strided_slice %3 {offsets = [0, 128], sizes = [8, 128], strides = [1, 1]} : vector<8x256xf32> to vector<8x128xf32>
    %c0_5 = arith.constant 0 : index
    %c0_6 = arith.constant 0 : index
    %6 = vector.load %arg4[%c0_5, %c0_6] : memref<8x1xf32, #tpu.memory_space<vmem>>, vector<8x1xf32>
    %c0_7 = arith.constant 0 : index
    %c0_8 = arith.constant 0 : index
    %7 = vector.load %arg6[%c0_7, %c0_8] : memref<8x128xf32, #tpu.memory_space<vmem>>, vector<1x128xf32>
    %c1 = arith.constant 1 : index
    %c0_9 = arith.constant 0 : index
    %8 = vector.load %arg6[%c1, %c0_9] : memref<8x128xf32, #tpu.memory_space<vmem>>, vector<1x128xf32>
    %c2 = arith.constant 2 : index
    %c0_10 = arith.constant 0 : index
    %9 = vector.load %arg6[%c2, %c0_10] : memref<8x128xf32, #tpu.memory_space<vmem>>, vector<1x128xf32>
    %c3 = arith.constant 3 : index
    %c0_11 = arith.constant 0 : index
    %10 = vector.load %arg6[%c3, %c0_11] : memref<8x128xf32, #tpu.memory_space<vmem>>, vector<1x128xf32>
    %c4 = arith.constant 4 : index
    %c0_12 = arith.constant 0 : index
    %11 = vector.load %arg6[%c4, %c0_12] : memref<8x128xf32, #tpu.memory_space<vmem>>, vector<1x128xf32>
    %c5 = arith.constant 5 : index
    %c0_13 = arith.constant 0 : index
    %12 = vector.load %arg6[%c5, %c0_13] : memref<8x128xf32, #tpu.memory_space<vmem>>, vector<1x128xf32>
    %13 = vector.broadcast %0 : f32 to vector<8x1xf32>
    %14 = arith.mulf %13, %6 : vector<8x1xf32>
    %cst_14 = arith.constant 9.99999974E-6 : f32
    %15 = vector.broadcast %cst_14 : f32 to vector<8x1xf32>
    %16 = arith.subf %14, %15 : vector<8x1xf32>
    %cst_15 = arith.constant -2.000000e+00 : f32
    %17 = arith.mulf %cst_15, %0 : f32
    %18 = vector.broadcast %17 : f32 to vector<8x128xf32>
    %19 = arith.mulf %18, %4 : vector<8x128xf32>
    %cst_16 = arith.constant 1.000010e+00 : f32
    %20 = vector.broadcast %cst_16 : f32 to vector<8x128xf32>
    %21 = arith.addf %20, %19 : vector<8x128xf32>
    %22 = vector.broadcast %16 : vector<8x1xf32> to vector<8x128xf32>
    %23 = arith.addf %21, %22 : vector<8x128xf32>
    %24 = vector.broadcast %10 : vector<1x128xf32> to vector<8x128xf32>
    %25 = vector.broadcast %6 : vector<8x1xf32> to vector<8x128xf32>
    %26 = arith.mulf %24, %25 : vector<8x128xf32>
    %27 = arith.addf %21, %26 : vector<8x128xf32>
    %28 = tpu.reciprocal %27 {approx = true} : vector<8x128xf32> -> vector<8x128xf32>
    %29 = arith.mulf %27, %28 : vector<8x128xf32>
    %cst_17 = arith.constant 2.000000e+00 : f32
    %30 = vector.broadcast %cst_17 : f32 to vector<8x128xf32>
    %31 = arith.subf %30, %29 : vector<8x128xf32>
    %32 = arith.mulf %28, %31 : vector<8x128xf32>
    %33 = arith.mulf %23, %32 : vector<8x128xf32>
    %34 = vector.broadcast %7 : vector<1x128xf32> to vector<8x128xf32>
    %35 = arith.mulf %34, %32 : vector<8x128xf32>
    %36 = arith.mulf %35, %5 : vector<8x128xf32>
    %37 = vector.broadcast %9 : vector<1x128xf32> to vector<8x128xf32>
    %38 = arith.mulf %33, %37 : vector<8x128xf32>
    %39 = arith.subf %36, %38 : vector<8x128xf32>
    %40 = arith.mulf %33, %35 : vector<8x128xf32>
    %41 = arith.mulf %33, %33 : vector<8x128xf32>
    %42 = vector.broadcast %8 : vector<1x128xf32> to vector<8x128xf32>
    %43 = arith.mulf %41, %42 : vector<8x128xf32>
    %44 = arith.addf %40, %40 : vector<8x128xf32>
    %45 = arith.mulf %44, %4 : vector<8x128xf32>
    %46 = arith.subf %43, %45 : vector<8x128xf32>
    %47 = arith.mulf %35, %35 : vector<8x128xf32>
    %48 = vector.broadcast %6 : vector<8x1xf32> to vector<8x128xf32>
    %49 = arith.mulf %47, %48 : vector<8x128xf32>
    %50 = arith.addf %46, %49 : vector<8x128xf32>
    %cst_18 = arith.constant 0.000000e+00 : f32
    %51 = vector.broadcast %cst_18 : f32 to vector<8x128xf32>
    %52 = arith.maximumf %50, %51 : vector<8x128xf32>
    %53 = vector.broadcast %0 : f32 to vector<8x128xf32>
    %54 = arith.mulf %53, %52 : vector<8x128xf32>
    %cst_19 = arith.constant 1.000000e+00 : f32
    %55 = vector.broadcast %cst_19 : f32 to vector<8x128xf32>
    %56 = arith.subf %55, %54 : vector<8x128xf32>
    %57 = tpu.reciprocal %56 {approx = true} : vector<8x128xf32> -> vector<8x128xf32>
    %58 = arith.mulf %56, %57 : vector<8x128xf32>
    %cst_20 = arith.constant 2.000000e+00 : f32
    %59 = vector.broadcast %cst_20 : f32 to vector<8x128xf32>
    %60 = arith.subf %59, %58 : vector<8x128xf32>
    %61 = arith.mulf %57, %60 : vector<8x128xf32>
    %62 = arith.mulf %56, %61 : vector<8x128xf32>
    %cst_21 = arith.constant 2.000000e+00 : f32
    %63 = vector.broadcast %cst_21 : f32 to vector<8x128xf32>
    %64 = arith.subf %63, %62 : vector<8x128xf32>
    %65 = arith.mulf %61, %64 : vector<8x128xf32>
    %66 = vector.broadcast %11 : vector<1x128xf32> to vector<8x128xf32>
    %67 = arith.mulf %66, %39 : vector<8x128xf32>
    %68 = arith.mulf %67, %65 : vector<8x128xf32>
    %cst_22 = arith.constant 0.000000e+00 : f32
    %69 = vector.broadcast %cst_22 : f32 to vector<8x128xf32>
    %70 = arith.cmpf oge, %68, %69 : vector<8x128xf32>
    %cst_23 = arith.constant 1.000000e+00 : f32
    %cst_24 = arith.constant -1.000000e+00 : f32
    %71 = vector.broadcast %cst_23 : f32 to vector<8x128xf32>
    %72 = vector.broadcast %cst_24 : f32 to vector<8x128xf32>
    %73 = arith.select %70, %71, %72 : vector<8x128xi1>, vector<8x128xf32>
    %74 = math.absf %68 : vector<8x128xf32>
    %75 = arith.mulf %68, %68 : vector<8x128xf32>
    %cst_25 = arith.constant 1.000000e+00 : f32
    %76 = vector.broadcast %cst_25 : f32 to vector<8x128xf32>
    %77 = arith.addf %75, %76 : vector<8x128xf32>
    %78 = math.sqrt %77 : vector<8x128xf32>
    %79 = arith.addf %74, %78 : vector<8x128xf32>
    %80 = math.log %79 : vector<8x128xf32>
    %81 = arith.mulf %73, %80 : vector<8x128xf32>
    %82 = vector.broadcast %12 : vector<1x128xf32> to vector<8x128xf32>
    %83 = arith.mulf %82, %81 : vector<8x128xf32>
    %c0_26 = arith.constant 0 : index
    %c0_27 = arith.constant 0 : index
    %84 = vector.load %arg7[%c0_26, %c0_27] : memref<8x128xf32, #tpu.memory_space<vmem>>, vector<8x128xf32>
    tpu.vector_store %arg7[%c0_26, %c0_27], %83 {strides = array<i32>} : memref<8x128xf32, #tpu.memory_space<vmem>>, vector<8x128xf32>,
    return
  }
  func.func @transform_0(%arg0: i32, %arg1: i32) -> (i32, i32) {
    %c0_i32 = arith.constant 0 : i32
    %c0_i32_0 = arith.constant 0 : i32
    %c0_i32_1 = arith.constant 0 : i32
    return %c0_i32, %c0_i32_0 : i32, i32
  }
  func.func @transform_1(%arg0: i32, %arg1: i32) -> (i32, i32) {
    %c0_i32 = arith.constant 0 : i32
    %c0_i32_0 = arith.constant 0 : i32
    return %arg1, %c0_i32 : i32, i32
  }
  func.func @transform_2(%arg0: i32, %arg1: i32) -> (i32, i32) {
    %c0_i32 = arith.constant 0 : i32
    %c0_i32_0 = arith.constant 0 : i32
    return %arg1, %c0_i32 : i32, i32
  }
  func.func @transform_3(%arg0: i32, %arg1: i32) -> (i32, i32) {
    %c0_i32 = arith.constant 0 : i32
    %c0_i32_0 = arith.constant 0 : i32
    return %c0_i32, %arg0 : i32, i32
  }
  func.func @transform_4(%arg0: i32, %arg1: i32) -> (i32, i32) {
    %c0_i32 = arith.constant 0 : i32
    %c0_i32_0 = arith.constant 0 : i32
    return %c0_i32, %arg0 : i32, i32
  }
  func.func @transform_5(%arg0: i32, %arg1: i32) -> (i32, i32) {
    %c0_i32 = arith.constant 0 : i32
    return %arg1, %arg0 : i32, i32
  }
}

</mosaic_0001>

<bundles_post_ra>
// kernel: hyperbolic_mlr.1
= control target key start
LH: loop header
LB: loop body
LE: loop exit
PB: predicated region body
PF: predicated region fallthrough
CT: control target
= control target key end

     0   :  { %v263_v4 = vmov 0.0   ;;  %v264_v7 = vmov 0   ;;  %s354_s0 = inlined_call_operand.<no memory space> [shape: f32[1,1], index: 0, kind: input, shape index: {}]   ;;  %s355_s1 = inlined_call_operand.vmem [shape: f32[8,32], index: 1, kind: input, shape index: {}]   ;;  %s356_s2 = inlined_call_operand.vmem [shape: f32[8,1], index: 2, kind: input, shape index: {}]   ;;  %s357_s3 = inlined_call_operand.vmem [shape: f32[32,256], index: 3, kind: input, shape index: {}]   ;;  %s358_s4 = inlined_call_operand.vmem [shape: f32[8,128], index: 4, kind: input, shape index: {}]   ;;  %s359_s5 = inlined_call_operand.hbm [shape: f32[8,128], index: 5, kind: output, shape index: {}]  }
   0x1   :  { %v31_v0 = vld [vmem:[%s357_s3 + $0x38] sm:$0xff]  ;;  %v30_v1 = vld [vmem:[%s357_s3 + $0x30] sm:$0xff]  ;;  %v29_v2 = vld [vmem:[%s357_s3 + $0x28] sm:$0xff]  ;;  %100 = vmatprep.mubr.f32.mxu0 %v263_v4  ;;  %v114_v5 = vstv %s354_s0  ;;  %232 = vset.pattern.permute.xlu0 %v264_v7 }
   0x2   :  { %60 = vmatprep.subr.mxu0 %v31_v0  ;;  %v28_v3 = vld [vmem:[%s357_s3 + $0x20] sm:$0xff]  ;;  %v27_v6 = vld [vmem:[%s357_s3 + $0x18] sm:$0xff]  ;;  %v26_v8 = vld [vmem:[%s357_s3 + $0x10] sm:$0xff] }
   0x3   :  { %61 = vmatpush1.msra.mxu0 %v30_v1  ;;  %v107_v9 = vld [vmem:[%s356_s2] sm:$0xff] }
   0x4   :  { %62 = vmatprep.subr.mxu0 %v29_v2 }
   0x5   :  { %11 = vsyncpa [#allocation4], 0  ;;  %63 = vmatpush1.msra.mxu0 %v28_v3  ;;  %v25_v10 = vld [vmem:[%s357_s3 + $0x8] sm:$0xff]  ;;  %133 = vperm.xlu0 %232, %v107_v9   ;;  %v115_v11 = vmul.f32 %v114_v5, %v107_v9  ;;  %v24_v12 = vld [vmem:[%s357_s3] sm:$0xff]  ;;  %vm32_vm0 = vcmask 261120   ;;  %s117_s16 = smul.f32 -2.0, %s354_s0 }
   0x6   :  { %64 = vmatprep.subr.mxu0 %v27_v6  ;;  %v23_v13 = vld [vmem:[%s355_s1] sm:$0xff]  ;;  %s266_s26 = smov [#allocation3]  }
   0x7   :  { %65 = vmatpush1.msra.mxu0 %v26_v8  ;;  %v221_v14 = vadd.f32 -1e-05, %v115_v11  ;;  %v222_v15 = vld [vmem:[%s358_s4 + $0x3] ss:$0 sm:$0xff]  ;;  %v118_v16 = vstv %s117_s16  ;;  %v223_v27 = vld [vmem:[%s358_s4] ss:$0 sm:$0xff] }
   0x8   :  { %66 = vmatprep.subr.mxu0 %v25_v10  ;;  %v225_v34 = vld [vmem:[%s358_s4 + $0x1] ss:$0 sm:$0xff]  ;;  %v224_v46 = vld [vmem:[%s358_s4 + $0x2] ss:$0 sm:$0xff]  ;;  %v226_v55 = vld [vmem:[%s358_s4 + $0x4] ss:$0 sm:$0xff] }
   0x9   :  { %67 = vmatpush1.msra.mxu0 %v24_v12  ;;  %123 = vperm.xlu0 %232, %v221_v14   ;;  %v227_v7 = vld [vmem:[%s358_s4 + $0x5] ss:$0 sm:$0xff]  ;;  %v265_v8 = vmov -1.0   ;;  %s212_s27 = sshll.u32 %s266_s26, 4  ;;  %s213_s27 = int_to_ptr.vmem [resolvable:$true] %s212_s27 }
   0xa   :  { %220 = vmatmul.mubr.msk.f32.vlgmr.msra.gmra.mxu0 %vm32_vm0, %v23_v13  ;;  %s241_s28 = scalar_lea.vmem %s213_s27, 128  ;;  %p246_p1 = scmp.lt.s32.totalorder %s213_s27, %s213_s27 }
   0xb   :  { %p242_p0 = scmp.ne.s32.totalorder %s213_s27, %s241_s28  ;;  %p247_p2 = scmp.lt.s32.totalorder %s241_s28, %s241_s28 }
   0xd   :  { %p248_p3 = por %p247_p2, %p246_p1 }
   0xf   :  { %p249_p4 = pnand %p248_p3, %p242_p0 }
  0x80   :  { %v134_v17 = vpop.permute.xlu0 %133 }
  0x81   :  { %v136_v19 = vmul.f32 %v222_v15, %v134_v17 }
  0x84   :  { %v124_v26 = vpop.permute.xlu0 %123 }
  0xca   :  { %v102_v18 = vpop.f32.mrf.mxu0 }
  0xcb   :  { %v119_v20 = vmul.f32 %v118_v16, %v102_v18 }
  0xcc   :  { %v104_v48 = vpop.f32.mrf.mxu0 }
  0xcd   :  { %v120_v21 = vadd.f32 1.00001, %v119_v20 }
  0xcf   :  { %v137_v22 = vadd.f32 %v136_v19, %v120_v21  ;;  %v126_v28 = vadd.f32 %v124_v26, %v120_v21 }
  0xd1   :  { %233 = vrcp.f32 %v137_v22 }
  0xde   :  { %v234_v23 = vpop.eup %233 }
  0xdf   :  { %v139_v24 = vmul.f32 %v234_v23, %v137_v22 }
  0xe1   :  { %v140_v25 = vsub.f32 2.0, %v139_v24 }
  0xe3   :  { %v141_v29 = vmul.f32 %v234_v23, %v140_v25 }
  0xe5   :  { %v142_v30 = vmul.f32 %v141_v29, %v126_v28  ;;  %v147_v31 = vmul.f32 %v223_v27, %v141_v29 }
  0xe7   :  { %v156_v32 = vmul.f32 %v142_v30, %v142_v30  ;;  %v155_v33 = vmul.f32 %v147_v31, %v142_v30  ;;  %v165_v36 = vmul.f32 %v147_v31, %v147_v31  ;;  %v148_v49 = vmul.f32 %v147_v31, %v104_v48 }
  0xe8   :  { %v153_v50 = vmul.f32 %v224_v46, %v142_v30 }
  0xe9   :  { %v162_v35 = vadd.f32 %v155_v33, %v155_v33  ;;  %v161_v37 = vmul.f32 %v225_v34, %v156_v32  ;;  %v166_v40 = vmul.f32 %v165_v36, %v134_v17 }
  0xea   :  { %v154_v53 = vsub.f32 %v148_v49, %v153_v50 }
  0xeb   :  { %v163_v38 = vmul.f32 %v162_v35, %v102_v18 }
  0xec   :  { %v182_v58 = vmul.f32 %v226_v55, %v154_v53 }
  0xed   :  { %v164_v39 = vsub.f32 %v161_v37, %v163_v38 }
  0xef   :  { %v167_v41 = vadd.f32 %v166_v40, %v164_v39 }
  0xf1   :  { %v168_v42 = vmax.f32 %v167_v41, 0.0 }
  0xf3   :  { %v169_v43 = vmul.f32 %v168_v42, %v114_v5 }
  0xf5   :  { %v170_v44 = vsub.f32 1.0, %v169_v43 }
  0xf7   :  { %235 = vrcp.f32 %v170_v44 }
 0x104   :  { %v236_v45 = vpop.eup %235 }
 0x105   :  { %v172_v47 = vmul.f32 %v236_v45, %v170_v44 }
 0x107   :  { %v173_v51 = vsub.f32 2.0, %v172_v47 }
 0x109   :  { %v174_v52 = vmul.f32 %v236_v45, %v173_v51 }
 0x10b   :  { %v175_v54 = vmul.f32 %v174_v52, %v170_v44 }
 0x10d   :  { %v176_v56 = vsub.f32 2.0, %v175_v54 }
 0x10f   :  { %v177_v57 = vmul.f32 %v176_v56, %v174_v52 }
 0x111   :  { %v183_v59 = vmul.f32 %v182_v58, %v177_v57 }
 0x113   :  { %v187_v60 = vmul.f32 %v183_v59, %v183_v59  ;;  %v186_v1 = vand.u32 2147483647, %v183_v59  ;;  %vm184_vm3 = vcmp.ge.f32.partialorder %v183_v59, 0.0 }
 0x114   :  { %v185_v9 = vsel %vm184_vm3, 1.0, %v265_v8 }
 0x115   :  { %v188_v61 = vadd.f32 1.0, %v187_v60 }
 0x117   :  { %237 = vrsqrt.f32 %v188_v61  ;;  %vm191_vm1 = vcmp.eq.f32.partialorder %v188_v61, inf  ;;  %v194_v0 = vand.u32 2147483648, %v188_v61  ;;  %vm193_vm2 = vcmp.eq.f32.partialorder %v188_v61, 0.0 }
 0x124   :  { %v238_v62 = vpop.eup %237 }
 0x125   :  { %v190_v63 = vmul.f32 %v238_v62, %v188_v61 }
 0x127   :  { %v192_v2 = vsel %vm191_vm1, %v188_v61, %v190_v63 }
 0x128   :  { %v195_v3 = vsel %vm193_vm2, %v194_v0, %v192_v2 }
 0x129   :  { %v196_v4 = vadd.f32 %v195_v3, %v186_v1 }
 0x12b   :  { %239 = vlog2.f32 %v196_v4 }
 0x138   :  { %v240_v5 = vpop.eup %239 }
 0x139   :  { %v198_v6 = vmul.f32 0.6931472, %v240_v5 }
 0x13b   :  { %v199_v10 = vmul.f32 %v198_v6, %v185_v9 }
 0x13d   :  { %v204_v11 = vmul.f32 %v227_v7, %v199_v10 }
 0x13f   :  { %205 = vst [vmem:[#allocation3] sm:$0xff] %v204_v11 }
 0x140   :  { %252 = shalt.err (!%p249_p4)
}
 0x141   :  { %215 = dma.vmem_to_hbm [thread:$0]  %s213_s27, 128, %s359_s5, [#allocation4]  }
 0x142   :  { %261 = dma.done.wait [#allocation4], 128  }
 0x143   :  { %262 = vsyncadd [#allocation4], 4294967168 }
 0x144   :  { %219 = vsyncpa [#allocation4], 1 }

</bundles_post_ra>
